<compile_context>
chip_gen: v6e
topology: v6e:2x2x1
jax: 0.10.0
libtpu: 0.0.40
codegen_flags: <defaults>
</compile_context>

<pallas_src>
import functools

import jax
import jax.numpy as jnp
from jax.experimental import pallas as pl
from jax.experimental.pallas import tpu as pltpu

_LANE = 128


def _gen_dice_kernel(x_ref, t_ref, out_ref, *, eps, num_classes, n_inner,
                     tile_s, hw, needs_mask):
    # x_ref:   (B, C, tile_s, 128)  logits tile (any float dtype)
    # t_ref:   (B, tile_s, 128)     int32 target tile
    # out_ref: (1, tile_s, 128)     f32 per-pixel loss accumulator, resident
    #                               across the inner ("arbitrary") grid axis.
    i = pl.program_id(1)

    @pl.when(i == 0)
    def _init():
        out_ref[...] = jnp.zeros_like(out_ref)

    x = x_ref[...].astype(jnp.float32)          # (B, C, TS, 128)
    t = t_ref[...]                              # (B, TS, 128)

    # Numerically stable softmax over the class axis (axis=1, non-minor).
    m = jnp.max(x, axis=1, keepdims=True)       # (B, 1, TS, 128)
    e = jnp.exp(x - m)                          # (B, C, TS, 128)
    inv_sum = 1.0 / jnp.sum(e, axis=1)          # (B, TS, 128) one divide/pixel

    n_acc = jnp.zeros((tile_s, _LANE), jnp.float32)
    d_acc = jnp.zeros((tile_s, _LANE), jnp.float32)

    # C is small and static -> unrolled Python loop.  p is never materialized:
    # pc is recomputed per class from e and inv_sum to keep live ranges flat.
    # TODO(synk): switch to a VMEM scratch for p + lax.fori_loop if C grows >~8.
    for c in range(num_classes):
        pc = e[:, c] * inv_sum                  # (B, TS, 128) softmax prob of c
        ohe = (t == c).astype(jnp.float32)      # (B, TS, 128)
        s_ohe = jnp.sum(ohe, axis=0)            # (TS, 128) per-pixel class volume
        inv = 1.0 / (s_ohe + eps)
        wl = inv * inv                          # per-pixel per-class weight
        num_c = jnp.sum(ohe * pc, axis=0)       # (TS, 128)
        den_c = s_ohe + jnp.sum(pc, axis=0)     # (TS, 128)  (== sum_b(ohe + pc))
        n_acc = n_acc + wl * num_c
        d_acc = d_acc + wl * den_c

    loss_tile = 1.0 - 2.0 * (n_acc / d_acc)     # (TS, 128) per-pixel loss

    if needs_mask:
        # Zero out padded pixels (beyond the real H*W extent).
        p_id = pl.program_id(0)
        base = (p_id * n_inner + i) * (tile_s * _LANE)
        row = jax.lax.broadcasted_iota(jnp.int32, (tile_s, _LANE), 0)
        lane = jax.lax.broadcasted_iota(jnp.int32, (tile_s, _LANE), 1)
        pix = base + row * _LANE + lane
        loss_tile = jnp.where(pix < hw, loss_tile, 0.0)

    out_ref[...] += loss_tile[None]


def gen_dice_loss(logits, targets, eps=10.0, *, tile_s=None, n_par=2):
    """Pallas TPU implementation of GenDiceLoss.forward.

    logits:  (B, C, H, W) float (f32 or bf16 — streamed in its own dtype)
    targets: (B, H, W)    integer class indices in [0, C)
    """
    B, C, H, W = logits.shape
    assert targets.shape == (B, H, W)
    hw = H * W
    s_rows = pl.cdiv(hw, _LANE)                 # flattened-spatial rows of 128

    # Pick a tile size (rows of 128 pixels): as big as a ~8 MiB double-buffer
    # budget allows (leaves headroom for the in-kernel f32 intermediates under
    # the 32 MiB default scoped VMEM on all of v5e/v6e/v7x), capped at what is
    # actually needed per core.
    if tile_s is None:
        itemsize = jnp.dtype(logits.dtype).itemsize
        per_row = (B * C * itemsize + B * 4) * _LANE   # logits + int32 targets
        budget = 8 * 1024 * 1024
        tile_s = min(256, budget // (2 * per_row))
    need = pl.cdiv(pl.cdiv(s_rows, n_par), 8) * 8      # per-core rows, mult of 8
    tile_s = min(int(tile_s), need)
    tile_s = max(8, (tile_s // 8) * 8)

    n_inner = pl.cdiv(s_rows, n_par * tile_s)
    s_pad = n_par * n_inner * tile_s
    pad = s_pad * _LANE - hw

    # Lane-dense flattened-spatial layout (free reshape for contiguous NCHW);
    # pad with class-0 / zero-logit pixels, masked out inside the kernel.
    x = logits.reshape(B, C, hw)
    t = targets.astype(jnp.int32).reshape(B, hw)
    if pad:
        x = jnp.pad(x, ((0, 0), (0, 0), (0, pad)))
        t = jnp.pad(t, ((0, 0), (0, pad)))
    x = x.reshape(B, C, s_pad, _LANE)
    t = t.reshape(B, s_pad, _LANE)

    kernel = functools.partial(
        _gen_dice_kernel,
        eps=float(eps),
        num_classes=C,
        n_inner=n_inner,
        tile_s=tile_s,
        hw=hw,
        needs_mask=(pad != 0),
    )

    partial = pl.pallas_call(
        kernel,
        out_shape=jax.ShapeDtypeStruct((n_par, tile_s, _LANE), jnp.float32),
        grid_spec=pltpu.PrefetchScalarGridSpec(
            num_scalar_prefetch=0,
            grid=(n_par, n_inner),
            in_specs=[
                pl.BlockSpec((B, C, tile_s, _LANE),
                             lambda p, i: (0, 0, p * n_inner + i, 0)),
                pl.BlockSpec((B, tile_s, _LANE),
                             lambda p, i: (0, p * n_inner + i, 0)),
            ],
            out_specs=pl.BlockSpec((1, tile_s, _LANE),
                                   lambda p, i: (p, 0, 0)),
        ),
        compiler_params=pltpu.CompilerParams(
            # p axis: independent per-core partials (megacore on v7x);
            # i axis: accumulation into the resident output block.
            dimension_semantics=("parallel", "arbitrary"),
        ),
    )(x, t)

    # Single final reduction + mean, outside the kernel.
    return jnp.sum(partial) / jnp.float32(hw)


def gen_dice_loss_ref(logits, targets, eps=10.0):
    """Pure-JAX reference mirroring the PyTorch code exactly."""
    B, C, H, W = logits.shape
    p = jax.nn.softmax(logits.astype(jnp.float32), axis=1)        # (B,C,H,W)
    ohe = jax.nn.one_hot(targets, C, dtype=jnp.float32)           # (B,H,W,C)
    wl = 1.0 / jnp.square(ohe.sum(axis=0) + eps)                  # (H,W,C)
    p_nhwc = jnp.transpose(p, (0, 2, 3, 1))                       # (B,H,W,C)
    num = (ohe * p_nhwc).sum(axis=0)                              # (H,W,C)
    den = (ohe + p_nhwc).sum(axis=0)                              # (H,W,C)
    num = (num * wl).sum(axis=-1)                                 # (H,W)
    den = (den * wl).sum(axis=-1)                                 # (H,W)
    return jnp.mean(1.0 - 2.0 * num / den)


if __name__ == "__main__":
    key = jax.random.PRNGKey(0)
    k1, k2 = jax.random.split(key)

    B, C, H, W = 2, 4, 16, 16
    logits = jax.random.normal(k1, (B, C, H, W), dtype=jnp.float32)
    targets = jax.random.randint(k2, (B, H, W), 0, C, dtype=jnp.int32)

    loss = gen_dice_loss(logits, targets, eps=10.0)
    loss = jax.block_until_ready(loss)

    ref = jax.block_until_ready(gen_dice_loss_ref(logits, targets, eps=10.0))
    assert jnp.allclose(loss, ref, atol=1e-5, rtol=1e-5), (loss, ref)

    print("KERNEL_OK")
</pallas_src>

<mosaic_0001>
module attributes {stable_mosaic.version = 11 : i64} {
  func.func @_gen_dice_kernel(%arg0: i32, %arg1: i32, %arg2: memref<2x4x8x128xf32, #tpu.memory_space<vmem>>, %arg3: memref<2x8x128xi32, #tpu.memory_space<vmem>>, %arg4: memref<1x8x128xf32, #tpu.memory_space<vmem>>) attributes {dimension_semantics = [#tpu.dimension_semantics<parallel>, #tpu.dimension_semantics<arbitrary>], iteration_bounds = array<i64: 2, 1>, scalar_prefetch = 0 : i64, scratch_operands = 0 : i64, tpu.core_type = #tpu.core_type<tc>, window_params = [{transform_indices = @transform_0, window_bounds = array<i64: 2, 4, 8, 128>}, {transform_indices = @transform_1, window_bounds = array<i64: 2, 8, 128>}, {transform_indices = @transform_2, window_bounds = array<i64: 1, 8, 128>}]} {
    %c0_i32 = arith.constant 0 : i32
    %0 = arith.cmpi eq, %arg1, %c0_i32 : i32
    %1 = arith.extui %0 : i1 to i32
    %c0_i32_0 = arith.constant 0 : i32
    %2 = arith.cmpi ne, %1, %c0_i32_0 : i32
    scf.if %2 {
      %cst_42 = arith.constant 0.000000e+00 : f32
      %122 = vector.broadcast %cst_42 : f32 to vector<1x8x128xf32>
      %c0_43 = arith.constant 0 : index
      %c0_44 = arith.constant 0 : index
      %c0_45 = arith.constant 0 : index
      %123 = vector.load %arg4[%c0_43, %c0_44, %c0_45] : memref<1x8x128xf32, #tpu.memory_space<vmem>>, vector<1x8x128xf32>
      tpu.vector_store %arg4[%c0_43, %c0_44, %c0_45], %122 {strides = array<i32>} : memref<1x8x128xf32, #tpu.memory_space<vmem>>, vector<1x8x128xf32>,
    } else {
    }
    %c0 = arith.constant 0 : index
    %c0_1 = arith.constant 0 : index
    %c0_2 = arith.constant 0 : index
    %c0_3 = arith.constant 0 : index
    %3 = vector.load %arg2[%c0, %c0_1, %c0_2, %c0_3] : memref<2x4x8x128xf32, #tpu.memory_space<vmem>>, vector<2x4x8x128xf32>
    %c0_4 = arith.constant 0 : index
    %c0_5 = arith.constant 0 : index
    %c0_6 = arith.constant 0 : index
    %4 = vector.load %arg3[%c0_4, %c0_5, %c0_6] : memref<2x8x128xi32, #tpu.memory_space<vmem>>, vector<2x8x128xi32>
    %cst = arith.constant dense<0xFF800000> : vector<2x8x128xf32>
    %5 = vector.multi_reduction <maximumf>, %3, %cst [1] : vector<2x4x8x128xf32> to vector<2x8x128xf32>
    %6 = vector.shape_cast %5 : vector<2x8x128xf32> to vector<2x1x8x128xf32>
    %7 = vector.broadcast %6 : vector<2x1x8x128xf32> to vector<2x4x8x128xf32>
    %8 = arith.subf %3, %7 : vector<2x4x8x128xf32>
    %9 = math.exp %8 : vector<2x4x8x128xf32>
    %cst_7 = arith.constant dense<0.000000e+00> : vector<2x8x128xf32>
    %10 = vector.multi_reduction <add>, %9, %cst_7 [1] : vector<2x4x8x128xf32> to vector<2x8x128xf32>
    %cst_8 = arith.constant 1.000000e+00 : f32
    %11 = vector.broadcast %cst_8 : f32 to vector<2x8x128xf32>
    %12 = arith.divf %11, %10 : vector<2x8x128xf32>
    %cst_9 = arith.constant 0.000000e+00 : f32
    %13 = vector.broadcast %cst_9 : f32 to vector<8x128xf32>
    %cst_10 = arith.constant 0.000000e+00 : f32
    %14 = vector.broadcast %cst_10 : f32 to vector<8x128xf32>
    %15 = vector.extract_strided_slice %9 {offsets = [0, 0, 0, 0], sizes = [2, 1, 8, 128], strides = [1, 1, 1, 1]} : vector<2x4x8x128xf32> to vector<2x1x8x128xf32>
    %16 = vector.shape_cast %15 : vector<2x1x8x128xf32> to vector<2x8x128xf32>
    %17 = arith.mulf %16, %12 : vector<2x8x128xf32>
    %c0_i32_11 = arith.constant 0 : i32
    %18 = vector.broadcast %c0_i32_11 : i32 to vector<2x8x128xi32>
    %19 = arith.cmpi eq, %4, %18 : vector<2x8x128xi32>
    %20 = arith.extui %19 : vector<2x8x128xi1> to vector<2x8x128xi32>
    %21 = arith.sitofp %20 : vector<2x8x128xi32> to vector<2x8x128xf32>
    %cst_12 = arith.constant dense<0.000000e+00> : vector<8x128xf32>
    %22 = vector.multi_reduction <add>, %21, %cst_12 [0] : vector<2x8x128xf32> to vector<8x128xf32>
    %cst_13 = arith.constant 1.000000e+01 : f32
    %23 = vector.broadcast %cst_13 : f32 to vector<8x128xf32>
    %24 = arith.addf %22, %23 : vector<8x128xf32>
    %cst_14 = arith.constant 1.000000e+00 : f32
    %25 = vector.broadcast %cst_14 : f32 to vector<8x128xf32>
    %26 = arith.divf %25, %24 : vector<8x128xf32>
    %27 = arith.mulf %26, %26 : vector<8x128xf32>
    %28 = arith.mulf %21, %17 : vector<2x8x128xf32>
    %cst_15 = arith.constant dense<0.000000e+00> : vector<8x128xf32>
    %29 = vector.multi_reduction <add>, %28, %cst_15 [0] : vector<2x8x128xf32> to vector<8x128xf32>
    %cst_16 = arith.constant dense<0.000000e+00> : vector<8x128xf32>
    %30 = vector.multi_reduction <add>, %17, %cst_16 [0] : vector<2x8x128xf32> to vector<8x128xf32>
    %31 = arith.addf %22, %30 : vector<8x128xf32>
    %32 = arith.mulf %27, %29 : vector<8x128xf32>
    %33 = arith.addf %13, %32 : vector<8x128xf32>
    %34 = arith.mulf %27, %31 : vector<8x128xf32>
    %35 = arith.addf %14, %34 : vector<8x128xf32>
    %36 = vector.extract_strided_slice %9 {offsets = [0, 1, 0, 0], sizes = [2, 1, 8, 128], strides = [1, 1, 1, 1]} : vector<2x4x8x128xf32> to vector<2x1x8x128xf32>
    %37 = vector.shape_cast %36 : vector<2x1x8x128xf32> to vector<2x8x128xf32>
    %38 = arith.mulf %37, %12 : vector<2x8x128xf32>
    %c1_i32 = arith.constant 1 : i32
    %39 = vector.broadcast %c1_i32 : i32 to vector<2x8x128xi32>
    %40 = arith.cmpi eq, %4, %39 : vector<2x8x128xi32>
    %41 = arith.extui %40 : vector<2x8x128xi1> to vector<2x8x128xi32>
    %42 = arith.sitofp %41 : vector<2x8x128xi32> to vector<2x8x128xf32>
    %cst_17 = arith.constant dense<0.000000e+00> : vector<8x128xf32>
    %43 = vector.multi_reduction <add>, %42, %cst_17 [0] : vector<2x8x128xf32> to vector<8x128xf32>
    %cst_18 = arith.constant 1.000000e+01 : f32
    %44 = vector.broadcast %cst_18 : f32 to vector<8x128xf32>
    %45 = arith.addf %43, %44 : vector<8x128xf32>
    %cst_19 = arith.constant 1.000000e+00 : f32
    %46 = vector.broadcast %cst_19 : f32 to vector<8x128xf32>
    %47 = arith.divf %46, %45 : vector<8x128xf32>
    %48 = arith.mulf %47, %47 : vector<8x128xf32>
    %49 = arith.mulf %42, %38 : vector<2x8x128xf32>
    %cst_20 = arith.constant dense<0.000000e+00> : vector<8x128xf32>
    %50 = vector.multi_reduction <add>, %49, %cst_20 [0] : vector<2x8x128xf32> to vector<8x128xf32>
    %cst_21 = arith.constant dense<0.000000e+00> : vector<8x128xf32>
    %51 = vector.multi_reduction <add>, %38, %cst_21 [0] : vector<2x8x128xf32> to vector<8x128xf32>
    %52 = arith.addf %43, %51 : vector<8x128xf32>
    %53 = arith.mulf %48, %50 : vector<8x128xf32>
    %54 = arith.addf %33, %53 : vector<8x128xf32>
    %55 = arith.mulf %48, %52 : vector<8x128xf32>
    %56 = arith.addf %35, %55 : vector<8x128xf32>
    %57 = vector.extract_strided_slice %9 {offsets = [0, 2, 0, 0], sizes = [2, 1, 8, 128], strides = [1, 1, 1, 1]} : vector<2x4x8x128xf32> to vector<2x1x8x128xf32>
    %58 = vector.shape_cast %57 : vector<2x1x8x128xf32> to vector<2x8x128xf32>
    %59 = arith.mulf %58, %12 : vector<2x8x128xf32>
    %c2_i32 = arith.constant 2 : i32
    %60 = vector.broadcast %c2_i32 : i32 to vector<2x8x128xi32>
    %61 = arith.cmpi eq, %4, %60 : vector<2x8x128xi32>
    %62 = arith.extui %61 : vector<2x8x128xi1> to vector<2x8x128xi32>
    %63 = arith.sitofp %62 : vector<2x8x128xi32> to vector<2x8x128xf32>
    %cst_22 = arith.constant dense<0.000000e+00> : vector<8x128xf32>
    %64 = vector.multi_reduction <add>, %63, %cst_22 [0] : vector<2x8x128xf32> to vector<8x128xf32>
    %cst_23 = arith.constant 1.000000e+01 : f32
    %65 = vector.broadcast %cst_23 : f32 to vector<8x128xf32>
    %66 = arith.addf %64, %65 : vector<8x128xf32>
    %cst_24 = arith.constant 1.000000e+00 : f32
    %67 = vector.broadcast %cst_24 : f32 to vector<8x128xf32>
    %68 = arith.divf %67, %66 : vector<8x128xf32>
    %69 = arith.mulf %68, %68 : vector<8x128xf32>
    %70 = arith.mulf %63, %59 : vector<2x8x128xf32>
    %cst_25 = arith.constant dense<0.000000e+00> : vector<8x128xf32>
    %71 = vector.multi_reduction <add>, %70, %cst_25 [0] : vector<2x8x128xf32> to vector<8x128xf32>
    %cst_26 = arith.constant dense<0.000000e+00> : vector<8x128xf32>
    %72 = vector.multi_reduction <add>, %59, %cst_26 [0] : vector<2x8x128xf32> to vector<8x128xf32>
    %73 = arith.addf %64, %72 : vector<8x128xf32>
    %74 = arith.mulf %69, %71 : vector<8x128xf32>
    %75 = arith.addf %54, %74 : vector<8x128xf32>
    %76 = arith.mulf %69, %73 : vector<8x128xf32>
    %77 = arith.addf %56, %76 : vector<8x128xf32>
    %78 = vector.extract_strided_slice %9 {offsets = [0, 3, 0, 0], sizes = [2, 1, 8, 128], strides = [1, 1, 1, 1]} : vector<2x4x8x128xf32> to vector<2x1x8x128xf32>
    %79 = vector.shape_cast %78 : vector<2x1x8x128xf32> to vector<2x8x128xf32>
    %80 = arith.mulf %79, %12 : vector<2x8x128xf32>
    %c3_i32 = arith.constant 3 : i32
    %81 = vector.broadcast %c3_i32 : i32 to vector<2x8x128xi32>
    %82 = arith.cmpi eq, %4, %81 : vector<2x8x128xi32>
    %83 = arith.extui %82 : vector<2x8x128xi1> to vector<2x8x128xi32>
    %84 = arith.sitofp %83 : vector<2x8x128xi32> to vector<2x8x128xf32>
    %cst_27 = arith.constant dense<0.000000e+00> : vector<8x128xf32>
    %85 = vector.multi_reduction <add>, %84, %cst_27 [0] : vector<2x8x128xf32> to vector<8x128xf32>
    %cst_28 = arith.constant 1.000000e+01 : f32
    %86 = vector.broadcast %cst_28 : f32 to vector<8x128xf32>
    %87 = arith.addf %85, %86 : vector<8x128xf32>
    %cst_29 = arith.constant 1.000000e+00 : f32
    %88 = vector.broadcast %cst_29 : f32 to vector<8x128xf32>
    %89 = arith.divf %88, %87 : vector<8x128xf32>
    %90 = arith.mulf %89, %89 : vector<8x128xf32>
    %91 = arith.mulf %84, %80 : vector<2x8x128xf32>
    %cst_30 = arith.constant dense<0.000000e+00> : vector<8x128xf32>
    %92 = vector.multi_reduction <add>, %91, %cst_30 [0] : vector<2x8x128xf32> to vector<8x128xf32>
    %cst_31 = arith.constant dense<0.000000e+00> : vector<8x128xf32>
    %93 = vector.multi_reduction <add>, %80, %cst_31 [0] : vector<2x8x128xf32> to vector<8x128xf32>
    %94 = arith.addf %85, %93 : vector<8x128xf32>
    %95 = arith.mulf %90, %92 : vector<8x128xf32>
    %96 = arith.addf %75, %95 : vector<8x128xf32>
    %97 = arith.mulf %90, %94 : vector<8x128xf32>
    %98 = arith.addf %77, %97 : vector<8x128xf32>
    %99 = arith.divf %96, %98 : vector<8x128xf32>
    %cst_32 = arith.constant 2.000000e+00 : f32
    %100 = vector.broadcast %cst_32 : f32 to vector<8x128xf32>
    %101 = arith.mulf %100, %99 : vector<8x128xf32>
    %cst_33 = arith.constant 1.000000e+00 : f32
    %102 = vector.broadcast %cst_33 : f32 to vector<8x128xf32>
    %103 = arith.subf %102, %101 : vector<8x128xf32>
    %c1_i32_34 = arith.constant 1 : i32
    %104 = arith.muli %arg0, %c1_i32_34 : i32
    %105 = arith.addi %104, %arg1 : i32
    %c1024_i32 = arith.constant 1024 : i32
    %106 = arith.muli %105, %c1024_i32 : i32
    %107 = tpu.iota {dimensions = array<i32: 0>} : vector<8x128xi32>
    %108 = tpu.iota {dimensions = array<i32: 1>} : vector<8x128xi32>
    %c128_i32 = arith.constant 128 : i32
    %109 = vector.broadcast %c128_i32 : i32 to vector<8x128xi32>
    %110 = arith.muli %107, %109 : vector<8x128xi32>
    %111 = vector.broadcast %106 : i32 to vector<8x128xi32>
    %112 = arith.addi %111, %110 : vector<8x128xi32>
    %113 = arith.addi %112, %108 : vector<8x128xi32>
    %c256_i32 = arith.constant 256 : i32
    %114 = vector.broadcast %c256_i32 : i32 to vector<8x128xi32>
    %115 = arith.cmpi slt, %113, %114 : vector<8x128xi32>
    %cst_35 = arith.constant 0.000000e+00 : f32
    %116 = vector.broadcast %cst_35 : f32 to vector<8x128xf32>
    %117 = arith.select %115, %103, %116 : vector<8x128xi1>, vector<8x128xf32>
    %c0_36 = arith.constant 0 : index
    %c0_37 = arith.constant 0 : index
    %c0_38 = arith.constant 0 : index
    %118 = vector.load %arg4[%c0_36, %c0_37, %c0_38] : memref<1x8x128xf32, #tpu.memory_space<vmem>>, vector<1x8x128xf32>
    %119 = vector.shape_cast %117 : vector<8x128xf32> to vector<1x8x128xf32>
    %120 = arith.addf %118, %119 : vector<1x8x128xf32>
    %c0_39 = arith.constant 0 : index
    %c0_40 = arith.constant 0 : index
    %c0_41 = arith.constant 0 : index
    %121 = vector.load %arg4[%c0_39, %c0_40, %c0_41] : memref<1x8x128xf32, #tpu.memory_space<vmem>>, vector<1x8x128xf32>
    tpu.vector_store %arg4[%c0_39, %c0_40, %c0_41], %120 {strides = array<i32>} : memref<1x8x128xf32, #tpu.memory_space<vmem>>, vector<1x8x128xf32>,
    return
  }
  func.func @transform_0(%arg0: i32, %arg1: i32) -> (i32, i32, i32, i32) {
    %c1_i32 = arith.constant 1 : i32
    %0 = arith.muli %arg0, %c1_i32 : i32
    %1 = arith.addi %0, %arg1 : i32
    %c0_i32 = arith.constant 0 : i32
    %c0_i32_0 = arith.constant 0 : i32
    %c0_i32_1 = arith.constant 0 : i32
    %c0_i32_2 = arith.constant 0 : i32
    return %c0_i32, %c0_i32_0, %1, %c0_i32_1 : i32, i32, i32, i32
  }
  func.func @transform_1(%arg0: i32, %arg1: i32) -> (i32, i32, i32) {
    %c1_i32 = arith.constant 1 : i32
    %0 = arith.muli %arg0, %c1_i32 : i32
    %1 = arith.addi %0, %arg1 : i32
    %c0_i32 = arith.constant 0 : i32
    %c0_i32_0 = arith.constant 0 : i32
    %c0_i32_1 = arith.constant 0 : i32
    return %c0_i32, %1, %c0_i32_0 : i32, i32, i32
  }
  func.func @transform_2(%arg0: i32, %arg1: i32) -> (i32, i32, i32) {
    %c0_i32 = arith.constant 0 : i32
    %c0_i32_0 = arith.constant 0 : i32
    %c0_i32_1 = arith.constant 0 : i32
    return %arg0, %c0_i32, %c0_i32_0 : i32, i32, i32
  }
}

</mosaic_0001>

<bundles_post_ra>
// kernel: tpu_custom_call.1
= control target key start
LH: loop header
LB: loop body
LE: loop exit
PB: predicated region body
PF: predicated region fallthrough
CT: control target
= control target key end

     0   :  { %s982_s0 = inlined_call_operand.hbm [shape: f32[2,4,16,128], index: 0, kind: input, shape index: {}]   ;;  %s983_s1 = inlined_call_operand.hbm [shape: s32[2,16,128], index: 1, kind: input, shape index: {}]   ;;  %s984_s2 = inlined_call_operand.hbm [shape: f32[2,8,128], index: 2, kind: output, shape index: {}]  }
   0x1   :  { %985 = sst [smem:[#allocation11_spill]] %s982_s0 }
   0x2   :  { %7 = vsyncpa [#allocation3], 0 }
   0x3   :  { %9 = vsyncpa [#allocation3 + $0x1], 0 }
   0x4   :  { %10 = vsyncpa [#allocation6], 0 }
   0x5   :  { %12 = vsyncpa [#allocation6 + $0x1], 0 }
   0x6   :  { %13 = vsyncpa [#allocation4], 0 }
   0x7   :  { %15 = vsyncpa [#allocation4 + $0x1], 0  ;;  %s789_s9 = smov 0   ;;  %s791_s10 = smov 0  }
   0x8   :  { %s793_s11 = smov 0   ;;  %s795_s12 = smov 0  }
   0x9   :  { %s797_s13 = smov 0   ;;  %s799_s14 = smov 0  }
   0xa LB: > { %s499_s15 = sadd.s32 4294967295, %s765_s14   ;;  %s500_s16 = sadd.s32 4294967294, %s765_s14   ;;  %s765_s14 = sphi %s799_s14, %s21_s14   ;;  %s761_s13 = sphi %s797_s13, %s998_s13   ;;  %s757_s12 = sphi %s795_s12, %s997_s12   ;;  %s753_s11 = sphi %s793_s11, %s996_s11   ;;  %s749_s10 = sphi %s791_s10, %s995_s10   ;;  %s745_s9 = sphi %s789_s9, %s994_s9  }
   0xb   : > { %s33_s17 = sadd.s32 1, %s761_s13  ;;  %s42_s18 = sadd.s32 1, %s753_s11 }
   0xc   : > { %p35_p0 = scmp.ge.s32.totalorder %s33_s17, 2  ;;  %p49_p1 = scmp.ne.s32.totalorder %s753_s11, %s749_s10 }
   0xd   : > { %p50_p2 = scmp.eq.s32.totalorder %s765_s14, 0  ;;  %p55_p3 = scmp.ne.s32.totalorder %s749_s10, %s745_s9 }
   0xe   : > { %s1000_s17 = smov (%p35_p0, %s33_s17), 0  ;;  %p56_p5 = scmp.eq.s32.totalorder %s499_s15, 0 }
   0xf   : > { %p830_p4 = por %p50_p2, %p49_p1  ;;  %s39_s20 = ssub.s32 %s761_s13, %s1000_s17 }
  0x10   : > { %p107_p6 = scmp.eq.s32.totalorder %s499_s15, 1  ;;  %p40_p7 = scmp.eq.s32.totalorder %s39_s20, 0 }
  0x11   : > { %p836_p8 = por %p56_p5, %p55_p3  ;;  %p113_p10 = scmp.eq.s32.totalorder %s500_s16, 1 }
  0x12   : > { %p840_p9 = por %p107_p6, %p49_p1  ;;  %p541_p13 = scmp.lt.s32.totalorder %s765_s14, 2 }
  0x13   : > { %s845_s23 = scalar_select %p40_p7, %s753_s11, %s42_s18  }
  0x14   : > { %p847_p11 = por %p113_p10, %p55_p3  ;;  %s854_s25 = sand.u32 1, %s753_s11  }
  0x15   : > { %s503_s26 = sshll.u32 %s854_s25, 6  ;;  %s504_s27 = sshll.u32 %s761_s13, 7 }
  0x16   : > { %s990_s0 = sld [smem:[#allocation11_spill]]  ;;  %s137_s3 = scalar_lea.vmem [#allocation2], %s503_s26 }
  0x17   : > { %s144_s4 = sshll.u32 %s137_s3, 4  ;;  %p865_p0 = pnand %p541_p13, %p830_p4  ;;  %s145_s4 = int_to_ptr.vmem [resolvable:$true] %s144_s4 }
  0x18   : > { %s134_s6 = scalar_lea.sflag [#allocation3], %s854_s25  ;;  %s638_s7 = scalar_lea.vmem %s145_s4, 1024 }
  0x19   : > { %p627_p1 = pneg %p865_p0  ;;  %p639_p2 = scmp.ne.s32.totalorder %s145_s4, %s638_s7 }
  0x1a   : > { %s767_s8 = smov [#allocation2]  }
  0x1b   : > { %p641_p3 = pnand %p639_p2, %p627_p1  ;;  %s643_s15 = sshll.u32 %s767_s8, 4  ;;  %s644_s15 = int_to_ptr.vmem [resolvable:$false] %s643_s15 }
  0x1c   : > { %s143_s30 = scalar_lea.hbm %s990_s0, %s504_s27  ;;  %s645_s16 = scalar_lea.vmem %s644_s15, 2048 }
  0x1d   : > { %p642_p5 = pneg %p641_p3  ;;  %p646_p6 = scmp.lt.s32.totalorder %s145_s4, %s644_s15 }
  0x1e   : > { %p647_p4 = scmp.lt.s32.totalorder %s645_s16, %s638_s7 }
  0x20   : > { %p648_p7 = por %p647_p4, %p646_p6 }
  0x22   : > { %p649_p10 = pnand %p648_p7, %p642_p5 }
  0x24   : > { %652 = shalt.err (!%p649_p10)
}
  0x25   : > { %s768_s18 = smov 256   ;;  %s769_s19 = smov 128  }
  0x26   : > { %s770_s20 = smov 8   ;;  %p507_p13 = scmp.ge.s32.totalorder %s765_s14, 1 }
  0x27   : > { %533 = dma.hbm_to_vmem [thread:$0]  (!%p865_p0), %s143_s30, 1024, %s145_s4, %s134_s6, %s768_s18, %s769_s19, %s770_s20  }
  0x28   : > { %p173_p2 = scmp.lt.s32.totalorder %s765_s14, 3  ;;  %s505_s26 = sshll.u32 %s854_s25, 4 }
  0x29   : > { %s164_s7 = scalar_lea.hbm %s983_s1, %s504_s27  ;;  %s158_s8 = scalar_lea.vmem [#allocation5], %s505_s26 }
  0x2a   : > { %p882_p3 = pnand %p507_p13, %p173_p2  ;;  %s165_s15 = sshll.u32 %s158_s8, 4  ;;  %s166_s15 = int_to_ptr.vmem [resolvable:$true] %s165_s15 }
  0x2b   : > { %s155_s16 = scalar_lea.sflag [#allocation6], %s854_s25  ;;  %s666_s0 = scalar_lea.vmem %s166_s15, 256 }
  0x2c   : > { %p667_p5 = scmp.ne.s32.totalorder %s166_s15, %s666_s0  ;;  %s771_s30 = smov [#allocation5]  }
  0x2d   : > { %s671_s4 = sshll.u32 %s771_s30, 4  ;;  %s672_s4 = int_to_ptr.vmem [resolvable:$false] %s671_s4 }
  0x2e   : > { %p669_p6 = pnand %p667_p5, %p627_p1  ;;  %s673_s6 = scalar_lea.vmem %s672_s4, 512 }
  0x2f   : > { %p674_p7 = scmp.lt.s32.totalorder %s166_s15, %s672_s4  ;;  %p675_p10 = scmp.lt.s32.totalorder %s673_s6, %s666_s0 }
  0x30   : > { %p670_p4 = pneg %p669_p6 }
  0x31   : > { %p676_p13 = por %p675_p10, %p674_p7 }
  0x33   : > { %p677_p2 = pnand %p676_p13, %p670_p4 }
  0x35   : > { %680 = shalt.err (!%p677_p2)
}
  0x36   : > { %536 = dma.hbm_to_vmem [thread:$0]  (!%p865_p0), %s164_s7, 256, %s166_s15, %s155_s16, %s768_s18, %s769_s19, %s770_s20  }
  0x37   : > { %177 = sbr.rel (%p882_p3) target bundleno = 161 (0xa1), region = 28  ;;  %s902_s25 = sand.u32 (!%p882_p3), 1, %s749_s10  }
  0x38   : > { %s508_s27 = sshll.u32 (!%p882_p3), %s902_s25, 6  ;;  %s180_s26 = scalar_lea.sflag (!%p882_p3), [#allocation3], %s902_s25 }
  0x39   : > { %s183_s0 = scalar_lea.vmem (!%p882_p3), [#allocation2], %s508_s27 }
  0x3c   : > { %732 = dma.done.wait (%p836_p8), %s180_s26, 1024  }
  0x3d   : > { %734 = vsyncadd (%p836_p8), %s180_s26, 4294966272  ;;  %s509_s5 = sshll.u32 %s902_s25, 4  ;;  %s189_s18 = scalar_lea.sflag [#allocation6], %s902_s25 }
  0x3e   : > { %s912_s19 = scalar_lea.vmem [#allocation5], %s509_s5 }
  0x3f   : > { %736 = dma.done.wait (%p836_p8), %s189_s18, 256  }
  0x40   : > { %738 = vsyncadd (%p836_p8), %s189_s18, 4294967040  ;;  %v225_v0 = vld [vmem:[%s183_s0] sm:$0xff]  ;;  %v226_v1 = vld [vmem:[%s183_s0 + $0x8] sm:$0xff]  ;;  %v772_v32 = vmov 0.0   ;;  %s519_s21 = sshll.u32 %s757_s12, 10  ;;  %s510_s20 = sshll.u32 %s902_s25, 3 }
  0x41   : > { %v227_v2 = vld [vmem:[%s183_s0 + $0x10] sm:$0xff]  ;;  %v228_v3 = vld [vmem:[%s183_s0 + $0x18] sm:$0xff]  ;;  %v229_v4 = vld [vmem:[%s183_s0 + $0x20] sm:$0xff]  ;;  %s521_s28 = sshll.u32 %s757_s12, 7  ;;  %s217_s29 = scalar_lea.vmem [#allocation7], %s510_s20 }
  0x42   : > { %v230_v5 = vld [vmem:[%s183_s0 + $0x28] sm:$0xff]  ;;  %v235_v6 = vmax.f32 %v225_v0, %v227_v2  ;;  %v231_v7 = vld [vmem:[%s183_s0 + $0x30] sm:$0xff]  ;;  %v232_v8 = vld [vmem:[%s183_s0 + $0x38] sm:$0xff]  ;;  %v236_v9 = vmax.f32 %v226_v1, %v228_v3  ;;  %s396_s3 = sshll.u32 %s217_s29, 4  ;;  %s394_s15 = scalar_lea.hbm %s984_s2, %s521_s28  ;;  %s397_s3 = int_to_ptr.vmem [resolvable:$true] %s396_s3 }
  0x43   : > { %v238_v10 = vmax.f32 %v229_v4, %v231_v7  ;;  %v239_v11 = vmax.f32 %v230_v5, %v232_v8  ;;  %v233_v29 = vld [vmem:[%s912_s19] sm:$0xff]  ;;  %v234_v30 = vld [vmem:[%s912_s19 + $0x8] sm:$0xff]  ;;  %s383_s16 = scalar_lea.sflag [#allocation4], %s902_s25  ;;  %s681_s30 = scalar_lea.vmem %s397_s3, 128 }
  0x44   : > { %v237_v12 = vmax.f32 %v235_v6, %v236_v9  ;;  %vm277_vm0 = vcmp.eq.s32.totalorder %v233_v29, 0  ;;  %vm278_vm1 = vcmp.eq.s32.totalorder %v234_v30, 0  ;;  %vm299_vm2 = vcmp.eq.s32.totalorder %v233_v29, 1  ;;  %p682_p8 = scmp.ne.s32.totalorder %s397_s3, %s681_s30  ;;  %s773_s4 = smov [#allocation7]  }
  0x45   : > { %v240_v13 = vmax.f32 %v238_v10, %v239_v11  ;;  %vm300_vm3 = vcmp.eq.s32.totalorder %v234_v30, 1  ;;  %v511_v33 = vsel %vm277_vm0, 1.0, %v772_v32  ;;  %v920_v34 = vsel %vm278_vm1, 1.0, %v772_v32  ;;  %s685_s6 = sshll.u32 %s773_s4, 4  ;;  %s686_s6 = int_to_ptr.vmem [resolvable:$false] %s685_s6 }
  0x46   : > { %v241_v14 = vsub.f32 %v225_v0, %v237_v12  ;;  %v242_v15 = vsub.f32 %v226_v1, %v237_v12  ;;  %v243_v16 = vsub.f32 %v227_v2, %v237_v12  ;;  %v244_v17 = vsub.f32 %v228_v3, %v237_v12  ;;  %p683_p0 = pnand %p682_p8, %p840_p9  ;;  %s687_s27 = scalar_lea.vmem %s686_s6, 256 }
  0x47   : > { %v245_v18 = vsub.f32 %v229_v4, %v240_v13  ;;  %v246_v19 = vsub.f32 %v230_v5, %v240_v13  ;;  %v247_v20 = vsub.f32 %v231_v7, %v240_v13  ;;  %v248_v24 = vsub.f32 %v232_v8, %v240_v13  ;;  %p688_p3 = scmp.lt.s32.totalorder %s397_s3, %s686_s6  ;;  %p689_p5 = scmp.lt.s32.totalorder %s687_s27, %s681_s30 }
  0x48   : > { %v249_v21 = vmul.f32 1.442695, %v241_v14  ;;  %v251_v22 = vmul.f32 1.442695, %v242_v15  ;;  %v253_v23 = vmul.f32 1.442695, %v243_v16  ;;  %v283_v37 = vadd.f32 %v920_v34, %v511_v33  ;;  %p684_p1 = pneg %p683_p0 }
  0x49   : > { %v255_v25 = vmul.f32 1.442695, %v244_v17  ;;  %v257_v26 = vmul.f32 1.442695, %v245_v18  ;;  %v259_v27 = vmul.f32 1.442695, %v246_v19  ;;  %p690_p6 = por %p689_p5, %p688_p3 }
  0x4a   : > { %595 = vpow2.f32 %v249_v21  ;;  %v261_v28 = vmul.f32 1.442695, %v247_v20  ;;  %v263_v31 = vmul.f32 1.442695, %v248_v24  ;;  %vm321_vm4 = vcmp.eq.s32.totalorder %v233_v29, 2 }
  0x4b   : > { %597 = vpow2.f32 %v251_v22  ;;  %vm322_vm5 = vcmp.eq.s32.totalorder %v234_v30, 2  ;;  %vm343_vm6 = vcmp.eq.s32.totalorder %v233_v29, 3  ;;  %vm344_vm7 = vcmp.eq.s32.totalorder %v234_v30, 3  ;;  %p691_p4 = pnand %p690_p6, %p684_p1 }
  0x4c   : > { %599 = vpow2.f32 %v253_v23  ;;  %v513_v35 = vsel %vm299_vm2, 1.0, %v772_v32  ;;  %v514_v36 = vsel %vm300_vm3, 1.0, %v772_v32  ;;  %v923_v38 = vsel %vm321_vm4, 1.0, %v772_v32 }
  0x4d   : > { %601 = vpow2.f32 %v255_v25  ;;  %v925_v39 = vsel %vm322_vm5, 1.0, %v772_v32  ;;  %v927_v41 = vsel %vm343_vm6, 1.0, %v772_v32  ;;  %v929_v42 = vsel %vm344_vm7, 1.0, %v772_v32 }
  0x4e   : > { %603 = vpow2.f32 %v257_v26  ;;  %v305_v44 = vadd.f32 %v514_v36, %v513_v35  ;;  %v327_v47 = vadd.f32 %v925_v39, %v923_v38  ;;  %v284_v49 = vadd.f32 10.0, %v283_v37 }
  0x4f   : > { %605 = vpow2.f32 %v259_v27  ;;  %v349_v50 = vadd.f32 %v929_v42, %v927_v41 }
  0x50   : > { %607 = vpow2.f32 %v261_v28  ;;  %v306_v54 = vadd.f32 10.0, %v305_v44  ;;  %v328_v58 = vadd.f32 10.0, %v327_v47 }
  0x51   : > { %609 = vpow2.f32 %v263_v31  ;;  %v350_v60 = vadd.f32 10.0, %v349_v50 }
  0x52   : > { %611 = vrcp.f32 %v284_v49 }
  0x57   : > { %v596_v40 = vpop.eup %595 }
  0x58   : > { %v598_v43 = vpop.eup %597 }
  0x59   : > { %v600_v45 = vpop.eup %599  ;;  %v265_v46 = vadd.f32 %v598_v43, %v596_v40 }
  0x5a   : > { %v602_v48 = vpop.eup %601 }
  0x5b   : > { %v604_v51 = vpop.eup %603  ;;  %v266_v52 = vadd.f32 %v600_v45, %v265_v46 }
  0x5c   : > { %v606_v53 = vpop.eup %605 }
  0x5d   : > { %v608_v55 = vpop.eup %607  ;;  %v267_v56 = vadd.f32 %v602_v48, %v266_v52  ;;  %v268_v57 = vadd.f32 %v606_v53, %v604_v51 }
  0x5e   : > { %v610_v59 = vpop.eup %609 }
  0x5f   : > { %v269_v61 = vadd.f32 %v608_v55, %v268_v57  ;;  %613 = vrcp.f32 %v267_v56  ;;  %v612_v63 = vpop.eup %611 }
  0x60   : > { %615 = vrcp.f32 %v306_v54  ;;  %v287_v13 = vmul.f32 %v612_v63, %v612_v63 }
  0x61   : > { %v270_v62 = vadd.f32 %v610_v59, %v269_v61  ;;  %617 = vrcp.f32 %v328_v58 }
  0x62   : > { %619 = vrcp.f32 %v350_v60 }
  0x63   : > { %621 = vrcp.f32 %v270_v62 }
  0x6c   : > { %v614_v0 = vpop.eup %613 }
  0x6d   : > { %v616_v1 = vpop.eup %615  ;;  %v275_v4 = vmul.f32 %v614_v0, %v596_v40  ;;  %v297_v5 = vmul.f32 %v614_v0, %v598_v43  ;;  %v319_v7 = vmul.f32 %v614_v0, %v600_v45  ;;  %v341_v8 = vmul.f32 %v614_v0, %v602_v48 }
  0x6e   : > { %v618_v2 = vpop.eup %617  ;;  %v309_v14 = vmul.f32 %v616_v1, %v616_v1 }
  0x6f   : > { %v620_v3 = vpop.eup %619  ;;  %v331_v17 = vmul.f32 %v618_v2, %v618_v2  ;;  %v288_v19 = vmul.f32 %v511_v33, %v275_v4  ;;  %v310_v20 = vmul.f32 %v513_v35, %v297_v5  ;;  %v332_v31 = vmul.f32 %v923_v38, %v319_v7 }
  0x70   : > { %v622_v6 = vpop.eup %621  ;;  %v353_v18 = vmul.f32 %v620_v3, %v620_v3 }
  0x71   : > { %v276_v9 = vmul.f32 %v622_v6, %v604_v51  ;;  %v298_v10 = vmul.f32 %v622_v6, %v606_v53  ;;  %v320_v11 = vmul.f32 %v622_v6, %v608_v55  ;;  %v342_v12 = vmul.f32 %v622_v6, %v610_v59 }
  0x72   : > { %v374_v55 = vstv %s519_s21 }
  0x73   : > { %v291_v15 = vadd.f32 %v276_v9, %v275_v4  ;;  %v313_v16 = vadd.f32 %v298_v10, %v297_v5  ;;  %v335_v21 = vadd.f32 %v320_v11, %v319_v7  ;;  %v357_v22 = vadd.f32 %v342_v12, %v341_v8 }
  0x74   : > { %v289_v23 = vmul.f32 %v920_v34, %v276_v9  ;;  %v311_v25 = vmul.f32 %v514_v36, %v298_v10  ;;  %v333_v32 = vmul.f32 %v925_v39, %v320_v11  ;;  %v354_v34 = vmul.f32 %v927_v41, %v341_v8 }
  0x75   : > { %v292_v24 = vadd.f32 %v291_v15, %v283_v37  ;;  %v314_v26 = vadd.f32 %v313_v16, %v305_v44  ;;  %v336_v27 = vadd.f32 %v335_v21, %v327_v47  ;;  %v358_v28 = vadd.f32 %v357_v22, %v349_v50 }
  0x76   : > { %v290_v43 = vadd.f32 %v289_v23, %v288_v19  ;;  %v312_v45 = vadd.f32 %v311_v25, %v310_v20  ;;  %v355_v36 = vmul.f32 %v929_v42, %v342_v12  ;;  %v369_v37 = vlaneseq }
  0x77   : > { %v295_v29 = vmul.f32 %v292_v24, %v287_v13  ;;  %v317_v30 = vmul.f32 %v314_v26, %v309_v14  ;;  %v339_v40 = vmul.f32 %v336_v27, %v331_v17  ;;  %v361_v35 = vmul.f32 %v358_v28, %v353_v18 }
  0x78   : > { %v293_v44 = vmul.f32 %v290_v43, %v287_v13  ;;  %v315_v47 = vmul.f32 %v312_v45, %v309_v14  ;;  %v334_v48 = vadd.f32 %v333_v32, %v332_v31  ;;  %v370_v38 = vshrl.u32 %v369_v37, 7 }
  0x79   : > { %v318_v33 = vadd.f32 %v317_v30, %v295_v29  ;;  %v356_v51 = vadd.f32 %v355_v36, %v354_v34  ;;  %v372_v41 = vand.u32 127, %v369_v37 }
  0x7a   : > { %v316_v39 = vadd.f32 %v315_v47, %v293_v44  ;;  %v337_v50 = vmul.f32 %v334_v48, %v331_v17  ;;  %v373_v52 = vmul.u32 128, %v370_v38 }
  0x7b   : > { %v340_v46 = vadd.f32 %v339_v40, %v318_v33  ;;  %v359_v54 = vmul.f32 %v356_v51, %v353_v18 }
  0x7c   : > { %v338_v53 = vadd.f32 %v337_v50, %v316_v39  ;;  %v375_v56 = vadd.s32 %v374_v55, %v373_v52 }
  0x7d   : > { %v362_v49 = vadd.f32 %v361_v35, %v340_v46 }
  0x7e   : > { %v360_v42 = vadd.f32 %v359_v54, %v338_v53  ;;  %v376_v58 = vadd.s32 %v375_v56, %v372_v41 }
  0x7f   : > { %623 = vrcp.f32 %v362_v49 }
  0x80   : > { %vm377_vm8 = vcmp.lt.s32.totalorder %v376_v58, 256 }
  0x8c   : > { %v624_v57 = vpop.eup %623 }
  0x8d   : > { %v364_v59 = vmul.f32 %v624_v57, %v360_v42 }
  0x8f   : > { %v365_v60 = vmul.f32 2.0, %v364_v59 }
  0x91   : > { %v366_v61 = vsub.f32 1.0, %v365_v60 }
  0x93   : > { %v378_v62 = vsel %vm377_vm8, %v366_v61, 0.0 }
  0x94   : > { %381 = vst [vmem:[%s217_s29] sm:$0xff] %v378_v62 }
  0x95   : > { %694 = shalt.err (!%p691_p4)
}
  0x96   : > { %s695_s12 = scalar_lea.hbm %s394_s15, 128  ;;  %s699_s0 = scalar_lea.hbm %s984_s2, 256 }
  0x97   : > { %p696_p7 = scmp.ne.s32.totalorder %s394_s15, %s695_s12  ;;  %p700_p2 = scmp.lt.s32.totalorder %s394_s15, %s984_s2 }
  0x98   : > { %p701_p8 = scmp.lt.s32.totalorder %s699_s0, %s695_s12 }
  0x99   : > { %p697_p10 = pnand %p696_p7, %p840_p9 }
  0x9a   : > { %p702_p0 = por %p701_p8, %p700_p2 }
  0x9b   : > { %p698_p13 = pneg %p697_p10 }
  0x9d   : > { %p703_p12 = pnand %p702_p0, %p698_p13 }
  0x9f   : > { %706 = shalt.err (!%p703_p12)
}
  0xa0   : > { %528 = dma.vmem_to_hbm [thread:$0]  (%p840_p9), %s397_s3, 128, %s394_s15, %s383_s16  }
  0xa1 PF: > { %s408_s19 = sand.u32 1, %s745_s9   ;;  %p993_p1 = scmp.ge.s32.totalorder %s765_s14, 2 }
  0xa2   : > { %s409_s21 = scalar_lea.sflag [#allocation4], %s408_s19 }
  0xa3   : > { %p538_p3 = pnand %p993_p1, %p847_p11 }
  0xa5   : > { %p539_p5 = pneg %p538_p3 }
  0xa7   : > { %740 = dma.done.wait (%p539_p5), %s409_s21, 128  }
  0xa8   : > { %742 = vsyncadd (%p539_p5), %s409_s21, 4294967168  ;;  %s21_s14 = sadd.s32 1, %s765_s14   ;;  %s994_s9 = smov %s749_s10 }
  0xa9   : > { %p18_p6 = scmp.ge.s32.totalorder %s21_s14, 4   ;;  %s995_s10 = smov %s753_s11 }
  0xaa   : > { %s996_s11 = smov %s845_s23  ;;  %s997_s12 = smov %s761_s13 }
  0xab   : > { %s998_s13 = smov %s1000_s17  ;;  %20 = sbr.rel (!%p18_p6) target bundleno = 10 (0xa), region = 90 }
  0xb0   :  { %414 = vsyncpa [#allocation3], 1 }
  0xb1   :  { %416 = vsyncpa [#allocation3 + $0x1], 1 }
  0xb2   :  { %417 = vsyncpa [#allocation6], 1 }
  0xb3   :  { %419 = vsyncpa [#allocation6 + $0x1], 1 }
  0xb4   :  { %420 = vsyncpa [#allocation4], 1 }
  0xb5   :  { %422 = vsyncpa [#allocation4 + $0x1], 1 }

</bundles_post_ra>
